<compile_context>
chip_gen: v5e
topology: v5e:2x2
jax: 0.10.0
libtpu: 0.0.40
codegen_flags: <defaults>
</compile_context>

<pallas_src>
import functools

import jax
import jax.numpy as jnp
from jax import lax
from jax.experimental import pallas as pl
from jax.experimental.pallas import tpu as pltpu

_BN_EPS = 1e-5
_NEG_PAD = -1e30  # bias for padded softmax lanes (NOT zero, so exp() -> 0)


def _round_up(n, m):
    return ((n + m - 1) // m) * m


def _maybe_cast(v, dt):
    return v if v.dtype == dt else v.astype(dt)


# --------------------------------------------------------------------------
# Pass 1: accumulate batch sum / sum-of-squares of h = x @ W1 + b1
# --------------------------------------------------------------------------
def _stats_kernel(x_ref, w1_ref, b1_ref, sum_ref, sq_ref, *, batch, block_b, dot_dtype):
    i = pl.program_id(0)

    @pl.when(i == 0)
    def _():
        sum_ref[...] = jnp.zeros_like(sum_ref)
        sq_ref[...] = jnp.zeros_like(sq_ref)

    x = _maybe_cast(x_ref[...], dot_dtype)
    w1 = _maybe_cast(w1_ref[...], dot_dtype)
    h = jnp.dot(x, w1, preferred_element_type=jnp.float32) + b1_ref[...]

    # Mask rows that are batch padding so they do not pollute the batch stats.
    row = i * block_b + lax.broadcasted_iota(jnp.int32, (block_b, 1), 0)
    h = jnp.where(row < batch, h, 0.0)

    sum_ref[...] += jnp.sum(h, axis=0, keepdims=True)
    sq_ref[...] += jnp.sum(h * h, axis=0, keepdims=True)


# --------------------------------------------------------------------------
# Pass 2: normalize + tanh + Linear2 + softmax, fully parallel over B tiles
# --------------------------------------------------------------------------
def _fwd_kernel(sum_ref, sq_ref, x_ref, w1_ref, b1_ref, gamma_ref, beta_ref,
                w2_ref, b2_ref, o_ref, *, batch, dot_dtype):
    inv_b = 1.0 / float(batch)
    mean = sum_ref[...] * inv_b
    var = jnp.maximum(sq_ref[...] * inv_b - mean * mean, 0.0)  # biased var (PyTorch BN)
    rstd = lax.rsqrt(var + _BN_EPS)
    scale = gamma_ref[...] * rstd
    shift = beta_ref[...] - mean * scale

    x = _maybe_cast(x_ref[...], dot_dtype)
    w1 = _maybe_cast(w1_ref[...], dot_dtype)
    h = jnp.dot(x, w1, preferred_element_type=jnp.float32) + b1_ref[...]

    t = jnp.tanh(h * scale + shift)                      # f32 elementwise (v5e-safe)

    t_mm = _maybe_cast(t, dot_dtype)
    w2 = _maybe_cast(w2_ref[...], dot_dtype)
    logits = jnp.dot(t_mm, w2, preferred_element_type=jnp.float32) + b2_ref[...]

    # Numerically stable softmax; padded lanes carry a -1e30 bias -> exp == 0.
    m = jnp.max(logits, axis=-1, keepdims=True)
    e = jnp.exp(logits - m)
    s = jnp.sum(e, axis=-1, keepdims=True)
    o_ref[...] = (e * pl.reciprocal(s, approx=False)).astype(o_ref.dtype)


# --------------------------------------------------------------------------
# Wrapper
# --------------------------------------------------------------------------
def net_forward(x, w1, b1, gamma, beta, w2, b2, *, block_b=None,
                dot_dtype=jnp.float32):
    """Full Net forward pass (training-mode BatchNorm batch statistics).

    x:     (B, E)   w1: (E, H)   b1/gamma/beta: (1, H) or (H,)
    w2:    (H, O)   b2: (1, O) or (O,)
    Returns (B, O) float32 softmax probabilities.
    """
    B, E = x.shape
    H = w1.shape[1]
    O = w2.shape[1]

    Hp = _round_up(H, 128)   # lane-pad hidden dim
    Op = _round_up(O, 128)   # lane-pad output dim (lane-dense stores)

    # 256 is MXU-friendly on v7x (2x256^2) and a multiple of 128 (v5e 4x128^2).
    if block_b is None:
        block_b = 256 if B >= 256 else _round_up(B, 8)
    Bp = _round_up(B, block_b)
    nb = Bp // block_b

    f32 = jnp.float32
    # Layout plumbing (one-time padding; in a real model this is precomputed).
    xp = jnp.zeros((Bp, E), f32).at[:B, :].set(x.astype(f32))
    w1p = jnp.zeros((E, Hp), f32).at[:, :H].set(w1.astype(f32))
    b1p = jnp.zeros((1, Hp), f32).at[:, :H].set(jnp.reshape(b1, (1, H)).astype(f32))
    gp = jnp.ones((1, Hp), f32).at[:, :H].set(jnp.reshape(gamma, (1, H)).astype(f32))
    bp = jnp.zeros((1, Hp), f32).at[:, :H].set(jnp.reshape(beta, (1, H)).astype(f32))
    w2p = jnp.zeros((Hp, Op), f32).at[:H, :O].set(w2.astype(f32))
    b2p = jnp.full((1, Op), _NEG_PAD, f32).at[:, :O].set(jnp.reshape(b2, (1, O)).astype(f32))

    const = lambda shape: pl.BlockSpec(shape, lambda i: (0, 0))  # VMEM-resident

    # ---- Pass 1: batch statistics (accumulator outputs, "arbitrary" axis) ----
    stats_kernel = functools.partial(_stats_kernel, batch=B, block_b=block_b,
                                     dot_dtype=dot_dtype)
    h_sum, h_sq = pl.pallas_call(
        stats_kernel,
        out_shape=(jax.ShapeDtypeStruct((1, Hp), f32),
                   jax.ShapeDtypeStruct((1, Hp), f32)),
        grid=(nb,),
        in_specs=[
            pl.BlockSpec((block_b, E), lambda i: (i, 0)),   # streaming x tile
            const((E, Hp)),                                 # resident W1
            const((1, Hp)),                                 # resident b1
        ],
        out_specs=(const((1, Hp)), const((1, Hp))),
        compiler_params=pltpu.CompilerParams(dimension_semantics=("arbitrary",)),
    )(xp, w1p, b1p)

    # ---- Pass 2: normalize + tanh + Linear2 + softmax ("parallel" axis) ----
    fwd_kernel = functools.partial(_fwd_kernel, batch=B, dot_dtype=dot_dtype)
    out_p = pl.pallas_call(
        fwd_kernel,
        out_shape=jax.ShapeDtypeStruct((Bp, Op), f32),
        grid=(nb,),
        in_specs=[
            const((1, Hp)),                                 # sum(h)
            const((1, Hp)),                                 # sum(h*h)
            pl.BlockSpec((block_b, E), lambda i: (i, 0)),   # streaming x tile
            const((E, Hp)),                                 # resident W1
            const((1, Hp)),                                 # resident b1
            const((1, Hp)),                                 # resident gamma
            const((1, Hp)),                                 # resident beta
            const((Hp, Op)),                                # resident W2
            const((1, Op)),                                 # resident b2 (pad = -1e30)
        ],
        out_specs=pl.BlockSpec((block_b, Op), lambda i: (i, 0)),
        compiler_params=pltpu.CompilerParams(dimension_semantics=("parallel",)),
    )(h_sum, h_sq, xp, w1p, b1p, gp, bp, w2p, b2p)

    return out_p[:B, :O]


# --------------------------------------------------------------------------
# Reference + init
# --------------------------------------------------------------------------
def _reference(x, w1, b1, gamma, beta, w2, b2):
    h = x @ w1 + b1
    mean = jnp.mean(h, axis=0, keepdims=True)
    var = jnp.mean((h - mean) ** 2, axis=0, keepdims=True)   # biased, training-mode BN
    hn = (h - mean) / jnp.sqrt(var + _BN_EPS) * gamma + beta
    logits = jnp.tanh(hn) @ w2 + b2
    return jax.nn.softmax(logits, axis=-1)


def init_params(key, embedding_dim, output_dim, hidden_dim):
    """PyTorch-style uniform fan-in init; Linear weights stored pre-transposed (in, out)."""
    k1, k2, k3, k4 = jax.random.split(key, 4)
    lim1 = 1.0 / jnp.sqrt(embedding_dim)
    lim2 = 1.0 / jnp.sqrt(hidden_dim)
    w1 = jax.random.uniform(k1, (embedding_dim, hidden_dim), jnp.float32, -lim1, lim1)
    b1 = jax.random.uniform(k2, (1, hidden_dim), jnp.float32, -lim1, lim1)
    gamma = jnp.ones((1, hidden_dim), jnp.float32)   # BatchNorm1d weight init
    beta = jnp.zeros((1, hidden_dim), jnp.float32)   # BatchNorm1d bias init
    w2 = jax.random.uniform(k3, (hidden_dim, output_dim), jnp.float32, -lim2, lim2)
    b2 = jax.random.uniform(k4, (1, output_dim), jnp.float32, -lim2, lim2)
    return w1, b1, gamma, beta, w2, b2


if __name__ == "__main__":
    # TODO(synk): fresh nn.Module defaults to train() -> BatchNorm uses *batch*
    # statistics; if eval()-mode semantics are wanted, feed running stats instead.

    # Small shapes consistent with Net(embedding_dim=32, output_dim=16, hidden_dim=64)
    B, E, H, O = 8, 32, 64, 16
    key = jax.random.PRNGKey(0)
    kx, kp, kx2 = jax.random.split(key, 3)
    x = jax.random.normal(kx, (B, E), dtype=jnp.float32)
    w1, b1, gamma, beta, w2, b2 = init_params(kp, E, O, H)

    # ---- f32 MXU operands (strict check) ----
    out = jax.block_until_ready(net_forward(x, w1, b1, gamma, beta, w2, b2))
    ref = _reference(x, w1, b1, gamma, beta, w2, b2)
    assert out.shape == (B, O)
    assert jnp.allclose(out, ref, atol=1e-4, rtol=1e-4)
    assert jnp.allclose(jnp.sum(out, axis=-1), 1.0, atol=1e-5)

    # ---- larger ragged batch, tiled grid + row masking + bf16 MXU operands ----
    B2 = 200
    x2 = jax.random.normal(kx2, (B2, E), dtype=jnp.float32)
    out2 = jax.block_until_ready(
        net_forward(x2, w1, b1, gamma, beta, w2, b2,
                    block_b=64, dot_dtype=jnp.bfloat16))
    ref2 = _reference(x2, w1, b1, gamma, beta, w2, b2)
    assert out2.shape == (B2, O)
    assert jnp.allclose(out2, ref2, atol=5e-2, rtol=5e-2)
    assert jnp.allclose(jnp.sum(out2, axis=-1), 1.0, atol=1e-3)

    print("KERNEL_OK")
</pallas_src>

<mosaic_0001>
module attributes {stable_mosaic.version = 11 : i64} {
  func.func @_stats_kernel(%arg0: i32, %arg1: memref<8x32xf32, #tpu.memory_space<vmem>>, %arg2: memref<32x128xf32, #tpu.memory_space<vmem>>, %arg3: memref<1x128xf32, #tpu.memory_space<vmem>>, %arg4: memref<1x128xf32, #tpu.memory_space<vmem>>, %arg5: memref<1x128xf32, #tpu.memory_space<vmem>>) attributes {dimension_semantics = [#tpu.dimension_semantics<arbitrary>], iteration_bounds = array<i64: 1>, scalar_prefetch = 0 : i64, scratch_operands = 0 : i64, tpu.core_type = #tpu.core_type<tc>, window_params = [{transform_indices = @transform_0, window_bounds = array<i64: 8, 32>}, {pipeline_mode = #tpu.pipeline_mode<synchronous>, transform_indices = @transform_1, window_bounds = array<i64: 32, 128>}, {pipeline_mode = #tpu.pipeline_mode<synchronous>, transform_indices = @transform_2, window_bounds = array<i64: 1, 128>}, {pipeline_mode = #tpu.pipeline_mode<synchronous>, transform_indices = @transform_3, window_bounds = array<i64: 1, 128>}, {pipeline_mode = #tpu.pipeline_mode<synchronous>, transform_indices = @transform_4, window_bounds = array<i64: 1, 128>}]} {
    %c0_i32 = arith.constant 0 : i32
    %0 = arith.cmpi eq, %arg0, %c0_i32 : i32
    %1 = arith.extui %0 : i1 to i32
    %c0_i32_0 = arith.constant 0 : i32
    %2 = arith.cmpi ne, %1, %c0_i32_0 : i32
    scf.if %2 {
      %cst_18 = arith.constant 0.000000e+00 : f32
      %30 = vector.broadcast %cst_18 : f32 to vector<1x128xf32>
      %c0_19 = arith.constant 0 : index
      %c0_20 = arith.constant 0 : index
      %31 = vector.load %arg4[%c0_19, %c0_20] : memref<1x128xf32, #tpu.memory_space<vmem>>, vector<1x128xf32>
      tpu.vector_store %arg4[%c0_19, %c0_20], %30 {strides = array<i32>} : memref<1x128xf32, #tpu.memory_space<vmem>>, vector<1x128xf32>,
      %cst_21 = arith.constant 0.000000e+00 : f32
      %32 = vector.broadcast %cst_21 : f32 to vector<1x128xf32>
      %c0_22 = arith.constant 0 : index
      %c0_23 = arith.constant 0 : index
      %33 = vector.load %arg5[%c0_22, %c0_23] : memref<1x128xf32, #tpu.memory_space<vmem>>, vector<1x128xf32>
      tpu.vector_store %arg5[%c0_22, %c0_23], %32 {strides = array<i32>} : memref<1x128xf32, #tpu.memory_space<vmem>>, vector<1x128xf32>,
    } else {
    }
    %c0 = arith.constant 0 : index
    %c0_1 = arith.constant 0 : index
    %3 = vector.load %arg1[%c0, %c0_1] : memref<8x32xf32, #tpu.memory_space<vmem>>, vector<8x32xf32>
    %c0_2 = arith.constant 0 : index
    %c0_3 = arith.constant 0 : index
    %4 = vector.load %arg2[%c0_2, %c0_3] : memref<32x128xf32, #tpu.memory_space<vmem>>, vector<32x128xf32>
    %cst = arith.constant dense<0.000000e+00> : vector<8x128xf32>
    %5 = tpu.matmul %3, %4, %cst {dimension_numbers = #tpu.dot_dimension_numbers<[1], [0], [0], [1], [0, 0, 1, 1], [], []>} : vector<8x32xf32>, vector<32x128xf32>, vector<8x128xf32> -> vector<8x128xf32>
    %c0_4 = arith.constant 0 : index
    %c0_5 = arith.constant 0 : index
    %6 = vector.load %arg3[%c0_4, %c0_5] : memref<1x128xf32, #tpu.memory_space<vmem>>, vector<1x128xf32>
    %7 = vector.broadcast %6 : vector<1x128xf32> to vector<8x128xf32>
    %8 = arith.addf %5, %7 : vector<8x128xf32>
    %c8_i32 = arith.constant 8 : i32
    %9 = arith.muli %arg0, %c8_i32 : i32
    %10 = tpu.iota {dimensions = array<i32: 0>} : vector<8x1xi32>
    %11 = vector.broadcast %9 : i32 to vector<8x1xi32>
    %12 = arith.addi %11, %10 : vector<8x1xi32>
    %c8_i32_6 = arith.constant 8 : i32
    %13 = vector.broadcast %c8_i32_6 : i32 to vector<8x1xi32>
    %14 = arith.cmpi slt, %12, %13 : vector<8x1xi32>
    %cst_7 = arith.constant 0.000000e+00 : f32
    %15 = vector.shape_cast %14 : vector<8x1xi1> to vector<8x1xi1>
    %16 = vector.broadcast %15 : vector<8x1xi1> to vector<8x128xi1>
    %17 = vector.broadcast %cst_7 : f32 to vector<8x128xf32>
    %18 = arith.select %16, %8, %17 : vector<8x128xi1>, vector<8x128xf32>
    %c0_8 = arith.constant 0 : index
    %c0_9 = arith.constant 0 : index
    %19 = vector.load %arg4[%c0_8, %c0_9] : memref<1x128xf32, #tpu.memory_space<vmem>>, vector<1x128xf32>
    %cst_10 = arith.constant dense<0.000000e+00> : vector<128xf32>
    %20 = vector.multi_reduction <add>, %18, %cst_10 [0] : vector<8x128xf32> to vector<128xf32>
    %21 = vector.shape_cast %20 : vector<128xf32> to vector<1x128xf32>
    %22 = arith.addf %19, %21 : vector<1x128xf32>
    %c0_11 = arith.constant 0 : index
    %c0_12 = arith.constant 0 : index
    %23 = vector.load %arg4[%c0_11, %c0_12] : memref<1x128xf32, #tpu.memory_space<vmem>>, vector<1x128xf32>
    tpu.vector_store %arg4[%c0_11, %c0_12], %22 {strides = array<i32>} : memref<1x128xf32, #tpu.memory_space<vmem>>, vector<1x128xf32>,
    %c0_13 = arith.constant 0 : index
    %c0_14 = arith.constant 0 : index
    %24 = vector.load %arg5[%c0_13, %c0_14] : memref<1x128xf32, #tpu.memory_space<vmem>>, vector<1x128xf32>
    %25 = arith.mulf %18, %18 : vector<8x128xf32>
    %cst_15 = arith.constant dense<0.000000e+00> : vector<128xf32>
    %26 = vector.multi_reduction <add>, %25, %cst_15 [0] : vector<8x128xf32> to vector<128xf32>
    %27 = vector.shape_cast %26 : vector<128xf32> to vector<1x128xf32>
    %28 = arith.addf %24, %27 : vector<1x128xf32>
    %c0_16 = arith.constant 0 : index
    %c0_17 = arith.constant 0 : index
    %29 = vector.load %arg5[%c0_16, %c0_17] : memref<1x128xf32, #tpu.memory_space<vmem>>, vector<1x128xf32>
    tpu.vector_store %arg5[%c0_16, %c0_17], %28 {strides = array<i32>} : memref<1x128xf32, #tpu.memory_space<vmem>>, vector<1x128xf32>,
    return
  }
  func.func @transform_0(%arg0: i32) -> (i32, i32) {
    %c0_i32 = arith.constant 0 : i32
    %c0_i32_0 = arith.constant 0 : i32
    return %arg0, %c0_i32 : i32, i32
  }
  func.func @transform_1(%arg0: i32) -> (i32, i32) {
    %c0_i32 = arith.constant 0 : i32
    %c0_i32_0 = arith.constant 0 : i32
    %c0_i32_1 = arith.constant 0 : i32
    return %c0_i32, %c0_i32_0 : i32, i32
  }
  func.func @transform_2(%arg0: i32) -> (i32, i32) {
    %c0_i32 = arith.constant 0 : i32
    %c0_i32_0 = arith.constant 0 : i32
    %c0_i32_1 = arith.constant 0 : i32
    return %c0_i32, %c0_i32_0 : i32, i32
  }
  func.func @transform_3(%arg0: i32) -> (i32, i32) {
    %c0_i32 = arith.constant 0 : i32
    %c0_i32_0 = arith.constant 0 : i32
    %c0_i32_1 = arith.constant 0 : i32
    return %c0_i32, %c0_i32_0 : i32, i32
  }
  func.func @transform_4(%arg0: i32) -> (i32, i32) {
    %c0_i32 = arith.constant 0 : i32
    %c0_i32_0 = arith.constant 0 : i32
    %c0_i32_1 = arith.constant 0 : i32
    return %c0_i32, %c0_i32_0 : i32, i32
  }
}

</mosaic_0001>

<bundles_post_ra>
// kernel: tpu_custom_call.1
= control target key start
LH: loop header
LB: loop body
LE: loop exit
PB: predicated region body
PF: predicated region fallthrough
CT: control target
= control target key end

     0   :  { %10 = vsyncpa [#allocation3], 0  ;;  %s309_s0 = inlined_call_operand.hbm [shape: f32[8,32], index: 0, kind: input, shape index: {}]   ;;  %s310_s1 = inlined_call_operand.hbm [shape: f32[32,128], index: 1, kind: input, shape index: {}]   ;;  %s311_s2 = inlined_call_operand.vmem [shape: f32[1,128], index: 2, kind: input, shape index: {}]   ;;  %s312_s3 = inlined_call_operand.hbm [shape: f32[1,128], index: 3, kind: output, shape index: {0}]   ;;  %s313_s4 = inlined_call_operand.hbm [shape: f32[1,128], index: 4, kind: output, shape index: {1}]  }
   0x1   :  { %11 = vsyncpa [#allocation6], 0 }
   0x2   :  { %12 = vsyncpa [#allocation4], 0 }
   0x3   :  { %13 = vsyncpa [#allocation9], 0  ;;  %s19_s17 = sshll.u32 %s309_s0, 4  ;;  %s262_s18 = smov [#allocation2]   ;;  %s20_s17 = int_to_ptr.hbm [resolvable:$true] %s19_s17 }
   0x4   :  { %s21_s19 = sshll.u32 %s262_s18, 4  ;;  %s29_s22 = sshll.u32 %s310_s1, 4  ;;  %s22_s19 = int_to_ptr.vmem [resolvable:$true] %s21_s19  ;;  %s30_s22 = int_to_ptr.hbm [resolvable:$true] %s29_s22 }
   0x5   :  { %24 = dma.hbm_to_vmem [thread:$0]  %s20_s17, 128, %s22_s19, [#allocation3]  }
   0x6   :  { %s263_s23 = smov [#allocation5]   ;;  %s264_s25 = smov 128  }
   0x7   :  { %s31_s24 = sshll.u32 %s263_s23, 4  ;;  %s265_s26 = smov 8   ;;  %s32_s24 = int_to_ptr.vmem [resolvable:$true] %s31_s24 }
   0x8   :  { %37 = dma.hbm_to_vmem [thread:$0]  %s30_s22, 512, %s32_s24, [#allocation6], %s264_s25, %s264_s25, %s265_s26  }
   0x9   :  { %254 = dma.done.wait [#allocation3], 128  }
   0xa   :  { %255 = vsyncadd [#allocation3], 4294967168 }
   0xb   :  { %256 = dma.done.wait [#allocation6], 512  }
   0xc   :  { %257 = vsyncadd [#allocation6], 4294966784  ;;  %v58_v0 = vld [vmem:[#allocation5 + $0x18] sm:$0xff]  ;;  %v57_v1 = vld [vmem:[#allocation5 + $0x10] sm:$0xff]  ;;  %vm63_vm0 = vcmask 261120   ;;  %v266_v5 = vmov 0.0  }
   0xd   :  { %79 = vmatpush.msra.mxu0 %v58_v0  ;;  %v56_v2 = vld [vmem:[#allocation5 + $0x8] sm:$0xff]  ;;  %v55_v3 = vld [vmem:[#allocation5] sm:$0xff]  ;;  %v54_v4 = vld [vmem:[#allocation2] sm:$0xff]  ;;  %52 = vst [vmem:[#allocation7] sm:$0x1] %v266_v5  ;;  %s267_s27 = smov [#allocation7]  }
   0xe   :  { %53 = vst [vmem:[#allocation8] sm:$0x1] %v266_v5  ;;  %v157_v6 = vld [vmem:[%s311_s2] ss:$0 sm:$0xff]  ;;  %s120_s28 = sshll.u32 %s267_s27, 4  ;;  %s122_s5 = sshll.u32 %s312_s3, 4  ;;  %s121_s28 = int_to_ptr.vmem [resolvable:$true] %s120_s28  ;;  %s123_s5 = int_to_ptr.hbm [resolvable:$true] %s122_s5 }
   0xf   :  { %80 = vmatpush.msra.mxu0 %v57_v1  ;;  %s268_s2 = smov [#allocation8]   ;;  %s133_s9 = sshll.u32 %s313_s4, 4  ;;  %s134_s9 = int_to_ptr.hbm [resolvable:$true] %s133_s9 }
  0x10   :  { %s131_s6 = sshll.u32 %s268_s2, 4  ;;  %s132_s6 = int_to_ptr.vmem [resolvable:$true] %s131_s6 }
  0x11   :  { %81 = vmatpush.msra.mxu0 %v56_v2 }
  0x13   :  { %82 = vmatpush.msra.mxu0 %v55_v3 }
  0x14   :  { %149 = vmatmul.msk.f32.vlgmr.msra.gmra.mxu0 %vm63_vm0, %v54_v4  ;;  %v96_v19 = vld [vmem:[#allocation7] sm:$0x1] }
  0x15   :  { %v105_v22 = vld [vmem:[#allocation8] sm:$0x1] }
  0x91   :  { %v84_v7 = vpop.f32.mrf.mxu0 }
  0x92   :  { %v85_v8 = vadd.f32 %v157_v6, %v84_v7 }
  0x94   :  { %v97_v9 = vrot.slane %v85_v8, 4  ;;  %v106_v10 = vmul.f32 %v85_v8, %v85_v8 }
  0x96   :  { %v98_v11 = vadd.f32 %v97_v9, %v85_v8  ;;  %v107_v12 = vrot.slane %v106_v10, 4 }
  0x98   :  { %v99_v13 = vrot.slane %v98_v11, 2  ;;  %v108_v14 = vadd.f32 %v107_v12, %v106_v10 }
  0x9a   :  { %v100_v15 = vadd.f32 %v99_v13, %v98_v11  ;;  %v109_v16 = vrot.slane %v108_v14, 2 }
  0x9c   :  { %v101_v17 = vrot.slane %v100_v15, 1  ;;  %v110_v18 = vadd.f32 %v109_v16, %v108_v14 }
  0x9e   :  { %v102_v20 = vadd.f32 %v101_v17, %v100_v15  ;;  %v111_v21 = vrot.slane %v110_v18, 1 }
  0xa0   :  { %v103_v23 = vadd.f32 %v102_v20, %v96_v19  ;;  %v112_v24 = vadd.f32 %v111_v21, %v110_v18 }
  0xa2   :  { %104 = vst [vmem:[#allocation7] sm:$0x1] %v103_v23  ;;  %v113_v25 = vadd.f32 %v112_v24, %v105_v22 }
  0xa3   :  { %125 = dma.vmem_to_hbm [thread:$0]  %s121_s28, 16, %s123_s5, [#allocation4]  }
  0xa4   :  { %114 = vst [vmem:[#allocation8] sm:$0x1] %v113_v25 }
  0xa5   :  { %136 = dma.vmem_to_hbm [thread:$0]  %s132_s6, 16, %s134_s9, [#allocation9]  }
  0xa6   :  { %258 = dma.done.wait [#allocation4], 16  }
  0xa7   :  { %259 = vsyncadd [#allocation4], 4294967280 }
  0xa8   :  { %260 = dma.done.wait [#allocation9], 16  }
  0xa9   :  { %261 = vsyncadd [#allocation9], 4294967280 }
  0xaa   :  { %145 = vsyncpa [#allocation3], 1 }
  0xab   :  { %146 = vsyncpa [#allocation6], 1 }
  0xac   :  { %147 = vsyncpa [#allocation4], 1 }
  0xad   :  { %148 = vsyncpa [#allocation9], 1 }

</bundles_post_ra>
